<compile_context>
chip_gen: v5e
topology: v5e:2x2
jax: 0.10.0
libtpu: 0.0.40
codegen_flags: <defaults>
</compile_context>

<pallas_src>
import jax
import jax.numpy as jnp
from jax.experimental import pallas as pl
from jax.experimental.pallas import tpu as pltpu

_VMEM_LIMIT = 32 * 1024 * 1024  # valid on v5e/v6e/v7x; raises v5e's 16MiB default


# --------------------------------------------------------------------------
# Kernel 1: bottleneck 1x1 conv  ->  feat_vec slab in (HW, B*Cout) layout
# --------------------------------------------------------------------------
def _bottleneck_kernel(x_ref, w_ref, b_ref, o_ref):
    # x_ref: (1, Cin, hw_blk) f32     w_ref: (Cout, Cin) f32
    # b_ref: (1, Cout) f32            o_ref: (hw_blk, Cout) slab of (HW, B*Cout)
    x = x_ref[0]                                                     # (Cin, hw)
    y = jnp.dot(w_ref[...], x, preferred_element_type=jnp.float32)   # (Cout, hw)
    # transpose the (small) result, add lane-dense bias, store lane-dense in C
    o_ref[...] = (y.T + b_ref[...]).astype(o_ref.dtype)              # (hw, Cout)


def bottleneck_conv1x1(x_nchw, weight, bias):
    """nn.Conv2d(Cin, Cout, kernel_size=1) on NCHW; returns feat_vec (HW, B, Cout)."""
    B, Cin, H, W = x_nchw.shape
    Cout = weight.shape[0]
    HW = H * W
    x = x_nchw.reshape(B, Cin, HW).astype(jnp.float32)
    w2d = weight.reshape(Cout, Cin).astype(jnp.float32)
    b_row = bias.reshape(1, Cout).astype(jnp.float32)

    # largest multiple-of-128 HW tile (<= 512); otherwise take the full HW
    hw_blk = HW
    for cand in (512, 384, 256, 128):
        if HW % cand == 0:
            hw_blk = cand
            break
    n_hw = HW // hw_blk

    out2d = pl.pallas_call(
        _bottleneck_kernel,
        out_shape=jax.ShapeDtypeStruct((HW, B * Cout), jnp.float32),
        grid_spec=pltpu.PrefetchScalarGridSpec(
            num_scalar_prefetch=0,
            grid=(B, n_hw),                      # both parallel (v7x megacore)
            in_specs=[
                pl.BlockSpec((1, Cin, hw_blk), lambda b, h: (b, 0, h)),
                pl.BlockSpec((Cout, Cin), lambda b, h: (0, 0)),
                pl.BlockSpec((1, Cout), lambda b, h: (0, 0)),
            ],
            out_specs=pl.BlockSpec((hw_blk, Cout), lambda b, h: (h, b)),
        ),
        compiler_params=pltpu.CompilerParams(
            dimension_semantics=("parallel", "parallel"),
            vmem_limit_bytes=_VMEM_LIMIT),
    )(x, w2d, b_row)
    # (HW, B*Cout) -> (HW, B, Cout) is a free, contiguous reshape
    return out2d.reshape(HW, B, Cout).astype(x_nchw.dtype)


# --------------------------------------------------------------------------
# Kernel 2: CORNER head fusion  (att = dec @ enc ; opt = att * enc), HW on lanes
# --------------------------------------------------------------------------
def _corner_fusion_kernel(enc_ref, dec_ref, att_ref, opt_ref):
    # enc_ref: (1, C, HW)   dec_ref: (1, Nq, C)
    # att_ref: (1, Nq, HW)  opt_ref: (1, Nq, C, HW)      (HW lane-dense everywhere)
    enc = enc_ref[0]                                              # (C, HW)
    dec = dec_ref[0]                                              # (Nq, C)
    att = jnp.dot(dec, enc, preferred_element_type=jnp.float32)   # (Nq, HW)
    att_ref[0] = att.astype(att_ref.dtype)
    # opt[q, c, hw] = att[q, hw] * enc[c, hw]  == torch permute(0,3,2,1) result
    opt_ref[0] = (att[:, None, :] * enc[None, :, :]).astype(opt_ref.dtype)


def corner_fusion(hs, memory, feat_len_s):
    """
    hs:     (1, B, Nq, C)   decoder output embeddings
    memory: (L, B, C)       encoder memory, L = HW_template + HW_search
    Returns att (B, HW, Nq) [torch layout] and opt (B, Nq, C, HW), HW = feat_len_s.
    """
    _, B, Nq, C = hs.shape
    HW = feat_len_s
    # Layout plumbing (wrapper side): present enc lane-dense in HW so the kernel
    # needs no XLU transposes and no lane-1 masked stores.
    enc_chw = jnp.transpose(memory[-HW:], (1, 2, 0)).astype(jnp.float32)  # (B, C, HW)
    dec = hs[0].astype(jnp.float32)                                       # (B, Nq, C)

    att_qh, opt = pl.pallas_call(
        _corner_fusion_kernel,
        out_shape=(
            jax.ShapeDtypeStruct((B, Nq, HW), jnp.float32),
            jax.ShapeDtypeStruct((B, Nq, C, HW), jnp.float32),
        ),
        grid_spec=pltpu.PrefetchScalarGridSpec(
            num_scalar_prefetch=0,
            grid=(B,),
            in_specs=[
                pl.BlockSpec((1, C, HW), lambda b: (b, 0, 0)),
                pl.BlockSpec((1, Nq, C), lambda b: (b, 0, 0)),
            ],
            out_specs=[
                pl.BlockSpec((1, Nq, HW), lambda b: (b, 0, 0)),
                pl.BlockSpec((1, Nq, C, HW), lambda b: (b, 0, 0, 0)),
            ],
        ),
        compiler_params=pltpu.CompilerParams(
            dimension_semantics=("parallel",),
            vmem_limit_bytes=_VMEM_LIMIT),
    )(enc_chw, dec)
    # TODO(synk): for large Nq (DETR-style heads) add parallel grid axes over
    # Nq / C so the per-step opt block fits v7x's 64 MiB VMEM; Nq=1 here.
    att = jnp.transpose(att_qh, (0, 2, 1)).astype(memory.dtype)  # (B, HW, Nq)
    return att, opt.astype(memory.dtype)


# --------------------------------------------------------------------------
# EXOTST wrapper (JAX / Pallas)
# --------------------------------------------------------------------------
class EXOTSTPallas:
    def __init__(self, num_channels, hidden_dim, num_queries, feat_sz, key):
        self.num_queries = num_queries
        self.feat_sz_s = int(feat_sz)
        self.feat_len_s = int(feat_sz ** 2)
        k1, k2, k3 = jax.random.split(key, 3)
        # nn.Embedding(num_queries, hidden_dim)
        self.query_embed = jax.random.normal(k1, (num_queries, hidden_dim), jnp.float32)
        # nn.Conv2d(num_channels, hidden_dim, kernel_size=1)
        fan_in = num_channels
        bound = 1.0 / (fan_in ** 0.5)
        self.bottleneck_w = jax.random.uniform(
            k2, (hidden_dim, num_channels, 1, 1), jnp.float32, -bound, bound)
        self.bottleneck_b = jax.random.uniform(
            k3, (hidden_dim,), jnp.float32, -bound, bound)

    # --- forward_backbone / adjust ---------------------------------------
    def adjust(self, src_feat, mask, pos_embed):
        """
        src_feat: (B, Cin, H, W)   mask: (B, H, W)   pos_embed: (B, Chid, H, W)
        Returns dict matching torch: feat (HW,B,C), mask (B,HW), pos (HW,B,C)
        """
        feat_vec = bottleneck_conv1x1(src_feat, self.bottleneck_w, self.bottleneck_b)
        pos_vec = jnp.transpose(
            pos_embed.reshape(pos_embed.shape[0], pos_embed.shape[1], -1), (2, 0, 1))
        mask_vec = mask.reshape(mask.shape[0], -1)
        return {'feat': feat_vec, 'mask': mask_vec, 'pos': pos_vec}

    def forward_backbone(self, src_feat, mask, pos_embed):
        # TODO(synk): backbone / positional-encoding submodules are external;
        # the backbone feature map is taken directly as an input here.
        return self.adjust(src_feat, mask, pos_embed)

    # --- forward_box_head, head_type == 'CORNER' --------------------------
    def forward_box_head_corner(self, hs, memory):
        """
        hs:     (1, B, Nq, C)
        memory: (L, B, C)
        Returns opt_feat (B*Nq, C, feat_sz, feat_sz) and att (B, HW, Nq).
        """
        att, opt = corner_fusion(hs, memory, self.feat_len_s)
        B, Nq, C, HW = opt.shape
        opt_feat = opt.reshape(B * Nq, C, self.feat_sz_s, self.feat_sz_s)
        # TODO(synk): self.box_head (Corner_Predictor) and box_xyxy_to_cxcywh
        # are external submodules not defined in this module; not translated.
        return opt_feat, att


# --------------------------------------------------------------------------
# Reference (pure JAX) for sanity checking
# --------------------------------------------------------------------------
def _ref_bottleneck_vec(x, w, b):
    B, Cin, H, W = x.shape
    Cout = w.shape[0]
    y = jnp.einsum('bch,oc->boh', x.reshape(B, Cin, H * W), w.reshape(Cout, Cin))
    y = y + b[None, :, None]
    return jnp.transpose(y, (2, 0, 1))            # (HW, B, Cout)


def _ref_corner(hs, memory, feat_len_s):
    enc_opt = jnp.transpose(memory[-feat_len_s:], (1, 0, 2))   # (B,HW,C)
    dec_opt = jnp.transpose(hs[0], (0, 2, 1))                  # (B,C,Nq)
    att = jnp.einsum('bhc,bcq->bhq', enc_opt, dec_opt)
    opt = enc_opt[..., None] * att[:, :, None, :]              # (B,HW,C,Nq)
    opt = jnp.transpose(opt, (0, 3, 2, 1))                     # (B,Nq,C,HW)
    return att, opt


if __name__ == "__main__":
    key = jax.random.PRNGKey(0)
    k_model, k_feat, k_pos, k_mem, k_hs = jax.random.split(key, 5)

    # small, tile-friendly shapes (C multiple of 128, HW multiple of 128)
    B = 2
    Cin = 64            # backbone.num_channels
    C = 128             # transformer.d_model / hidden_dim
    H = W = 16          # search-region feature map -> feat_sz_s = 16
    Nq = 1              # num_queries (STARK uses 1)
    feat_sz = 16
    HW_template = 64
    L = HW_template + H * W   # encoder memory length

    model = EXOTSTPallas(Cin, C, Nq, feat_sz, k_model)

    # ---- backbone adjust path ----
    src_feat = jax.random.normal(k_feat, (B, Cin, H, W), jnp.float32)
    pos_embed = jax.random.normal(k_pos, (B, C, H, W), jnp.float32)
    mask = jnp.zeros((B, H, W), jnp.bool_)

    seq_dict = model.forward_backbone(src_feat, mask, pos_embed)
    jax.block_until_ready(seq_dict['feat'])

    feat_ref_vec = _ref_bottleneck_vec(src_feat, model.bottleneck_w, model.bottleneck_b)
    assert jnp.allclose(seq_dict['feat'], feat_ref_vec, atol=1e-3, rtol=1e-3)
    assert seq_dict['feat'].shape == (H * W, B, C)
    assert seq_dict['mask'].shape == (B, H * W)
    assert seq_dict['pos'].shape == (H * W, B, C)

    # ---- CORNER head fusion path ----
    memory = jax.random.normal(k_mem, (L, B, C), jnp.float32)
    hs = jax.random.normal(k_hs, (1, B, Nq, C), jnp.float32)

    opt_feat, att = model.forward_box_head_corner(hs, memory)
    jax.block_until_ready(opt_feat)

    att_ref, opt_ref = _ref_corner(hs, memory, model.feat_len_s)
    opt_feat_ref = opt_ref.reshape(B * Nq, C, feat_sz, feat_sz)
    assert jnp.allclose(att, att_ref, atol=1e-3, rtol=1e-3)
    assert jnp.allclose(opt_feat, opt_feat_ref, atol=1e-3, rtol=1e-3)
    assert opt_feat.shape == (B * Nq, C, feat_sz, feat_sz)
    assert att.shape == (B, H * W, Nq)

    print("KERNEL_OK")
</pallas_src>

<mosaic_0001>
module attributes {stable_mosaic.version = 11 : i64} {
  func.func @_bottleneck_kernel(%arg0: i32, %arg1: i32, %arg2: memref<1x64x256xf32, #tpu.memory_space<vmem>>, %arg3: memref<128x64xf32, #tpu.memory_space<vmem>>, %arg4: memref<1x128xf32, #tpu.memory_space<vmem>>, %arg5: memref<256x128xf32, #tpu.memory_space<vmem>>) attributes {dimension_semantics = [#tpu.dimension_semantics<parallel>, #tpu.dimension_semantics<parallel>], iteration_bounds = array<i64: 2, 1>, scalar_prefetch = 0 : i64, scratch_operands = 0 : i64, tpu.core_type = #tpu.core_type<tc>, window_params = [{transform_indices = @transform_0, window_bounds = array<i64: 1, 64, 256>}, {pipeline_mode = #tpu.pipeline_mode<synchronous>, transform_indices = @transform_1, window_bounds = array<i64: 128, 64>}, {pipeline_mode = #tpu.pipeline_mode<synchronous>, transform_indices = @transform_2, window_bounds = array<i64: 1, 128>}, {transform_indices = @transform_3, window_bounds = array<i64: 256, 128>}]} {
    %c0 = arith.constant 0 : index
    %c0_0 = arith.constant 0 : index
    %c0_1 = arith.constant 0 : index
    %0 = vector.load %arg2[%c0, %c0_0, %c0_1] : memref<1x64x256xf32, #tpu.memory_space<vmem>>, vector<1x64x256xf32>
    %1 = vector.shape_cast %0 : vector<1x64x256xf32> to vector<64x256xf32>
    %c0_2 = arith.constant 0 : index
    %c0_3 = arith.constant 0 : index
    %2 = vector.load %arg3[%c0_2, %c0_3] : memref<128x64xf32, #tpu.memory_space<vmem>>, vector<128x64xf32>
    %cst = arith.constant dense<0.000000e+00> : vector<128x256xf32>
    %3 = tpu.matmul %2, %1, %cst {dimension_numbers = #tpu.dot_dimension_numbers<[1], [0], [0], [1], [0, 0, 1, 1], [], []>} : vector<128x64xf32>, vector<64x256xf32>, vector<128x256xf32> -> vector<128x256xf32>
    %4 = tpu.transpose %3, [1, 0] : vector<128x256xf32> -> vector<256x128xf32>
    %c0_4 = arith.constant 0 : index
    %c0_5 = arith.constant 0 : index
    %5 = vector.load %arg4[%c0_4, %c0_5] : memref<1x128xf32, #tpu.memory_space<vmem>>, vector<1x128xf32>
    %6 = vector.broadcast %5 : vector<1x128xf32> to vector<256x128xf32>
    %7 = arith.addf %4, %6 : vector<256x128xf32>
    %c0_6 = arith.constant 0 : index
    %c0_7 = arith.constant 0 : index
    %8 = vector.load %arg5[%c0_6, %c0_7] : memref<256x128xf32, #tpu.memory_space<vmem>>, vector<256x128xf32>
    tpu.vector_store %arg5[%c0_6, %c0_7], %7 {strides = array<i32>} : memref<256x128xf32, #tpu.memory_space<vmem>>, vector<256x128xf32>,
    return
  }
  func.func @transform_0(%arg0: i32, %arg1: i32) -> (i32, i32, i32) {
    %c0_i32 = arith.constant 0 : i32
    %c0_i32_0 = arith.constant 0 : i32
    return %arg0, %c0_i32, %arg1 : i32, i32, i32
  }
  func.func @transform_1(%arg0: i32, %arg1: i32) -> (i32, i32) {
    %c0_i32 = arith.constant 0 : i32
    %c0_i32_0 = arith.constant 0 : i32
    %c0_i32_1 = arith.constant 0 : i32
    return %c0_i32, %c0_i32_0 : i32, i32
  }
  func.func @transform_2(%arg0: i32, %arg1: i32) -> (i32, i32) {
    %c0_i32 = arith.constant 0 : i32
    %c0_i32_0 = arith.constant 0 : i32
    %c0_i32_1 = arith.constant 0 : i32
    return %c0_i32, %c0_i32_0 : i32, i32
  }
  func.func @transform_3(%arg0: i32, %arg1: i32) -> (i32, i32) {
    %c0_i32 = arith.constant 0 : i32
    return %arg1, %arg0 : i32, i32
  }
}

</mosaic_0001>

<bundles_post_ra>
// kernel: tpu_custom_call.1
= control target key start
LH: loop header
LB: loop body
LE: loop exit
PB: predicated region body
PF: predicated region fallthrough
CT: control target
= control target key end

     0   :  { %8 = vsyncpa [#allocation3], 0  ;;  %s1219_s0 = inlined_call_operand.hbm [shape: f32[2,64,256], index: 0, kind: input, shape index: {}]   ;;  %s1220_s1 = inlined_call_operand.vmem [shape: f32[128,64], index: 1, kind: input, shape index: {}]   ;;  %s1221_s2 = inlined_call_operand.vmem [shape: f32[1,128], index: 2, kind: input, shape index: {}]   ;;  %s1222_s3 = inlined_call_operand.hbm [shape: f32[256,256], index: 3, kind: output, shape index: {}]  }
   0x1   :  { %10 = vsyncpa [#allocation3 + $0x1], 0 }
   0x2   :  { %11 = vsyncpa [#allocation4], 0 }
   0x3   :  { %13 = vsyncpa [#allocation4 + $0x1], 0  ;;  %s928_s12 = smov 0   ;;  %s930_s13 = smov 0  }
   0x4   :  { %s932_s14 = smov 0   ;;  %s934_s15 = smov 0  }
   0x5   :  { %s936_s16 = smov 0   ;;  %s938_s17 = smov 0  }
   0x6 LB: > { %s658_s18 = sadd.s32 4294967295, %s901_s17   ;;  %s659_s19 = sadd.s32 4294967294, %s901_s17   ;;  %s901_s17 = sphi %s938_s17, %s19_s17   ;;  %s897_s16 = sphi %s936_s16, %s1231_s16   ;;  %s893_s15 = sphi %s934_s15, %s1230_s15   ;;  %s889_s14 = sphi %s932_s14, %s1229_s14   ;;  %s885_s13 = sphi %s930_s13, %s1228_s13   ;;  %s881_s12 = sphi %s928_s12, %s1227_s12  }
   0x7   : > { %s31_s20 = sadd.s32 1, %s897_s16  ;;  %s40_s21 = sadd.s32 1, %s889_s14 }
   0x8   : > { %p33_p0 = scmp.ge.s32.totalorder %s31_s20, 2  ;;  %p47_p1 = scmp.ne.s32.totalorder %s889_s14, %s885_s13 }
   0x9   : > { %p48_p2 = scmp.eq.s32.totalorder %s901_s17, 0  ;;  %p53_p3 = scmp.ne.s32.totalorder %s885_s13, %s881_s12 }
   0xa   : > { %s1233_s20 = smov (%p33_p0, %s31_s20), 0  ;;  %p54_p5 = scmp.eq.s32.totalorder %s658_s18, 0 }
   0xb   : > { %p969_p4 = por %p48_p2, %p47_p1  ;;  %s35_s23 = ssub.s32 %s897_s16, %s1233_s20 }
   0xc   : > { %p121_p6 = scmp.eq.s32.totalorder %s658_s18, 1  ;;  %p38_p7 = scmp.eq.s32.totalorder %s35_s23, 0 }
   0xd   : > { %p975_p8 = por %p54_p5, %p53_p3  ;;  %p127_p10 = scmp.eq.s32.totalorder %s659_s19, 1 }
   0xe   : > { %p979_p9 = por %p121_p6, %p47_p1  ;;  %p661_p12 = scmp.ge.s32.totalorder %s901_s17, 2 }
   0xf   : > { %s984_s26 = scalar_select %p38_p7, %s889_s14, %s40_s21  }
  0x10   : > { %p986_p11 = por %p127_p10, %p53_p3  ;;  %p733_p13 = scmp.lt.s32.totalorder %s901_s17, 2 }
  0x11   : > { %s153_s28 = sand.u32 1, %s889_s14   ;;  %s704_s30 = sshll.u32 %s897_s16, 7 }
  0x12   : > { %s662_s29 = sshll.u32 %s153_s28, 7  ;;  %s164_s6 = scalar_lea.hbm %s1219_s0, %s704_s30 }
  0x13   : > { %s157_s7 = scalar_lea.vmem [#allocation2], %s662_s29  ;;  %s165_s9 = sshll.u32 %s164_s6, 4  ;;  %s166_s9 = int_to_ptr.hbm [resolvable:$true] %s165_s9 }
  0x14   : > { %s167_s8 = sshll.u32 %s157_s7, 4  ;;  %p726_p0 = pnand %p733_p13, %p969_p4  ;;  %s168_s8 = int_to_ptr.vmem [resolvable:$true] %s167_s8 }
  0x15   : > { %p665_p1 = scmp.ge.s32.totalorder %s901_s17, 1  ;;  %s154_s10 = scalar_lea.sflag [#allocation3], %s153_s28 }
  0x16   : > { %s903_s11 = smov 256   ;;  %s904_s18 = smov 16  }
  0x17   : > { %728 = dma.hbm_to_vmem [thread:$0]  (!%p726_p0), %s166_s9, 2048, %s168_s8, %s154_s10, %s903_s11, %s903_s11, %s904_s18  }
  0x18   : > { %p175_p2 = scmp.lt.s32.totalorder %s901_s17, 3 }
  0x1a   : > { %p176_p3 = pnand %p665_p1, %p175_p2 }
  0x1b   : > { %s1002_s19 = sand.u32 (!%p176_p3), 1, %s885_s13  }
  0x1c   : > { %179 = sbr.rel (%p176_p3) target bundleno = 469 (0x1d5), region = 32  ;;  %s666_s21 = sshll.u32 (!%p176_p3), %s1002_s19, 7 }
  0x1d   : > { %s182_s23 = scalar_lea.sflag (!%p176_p3), [#allocation3], %s1002_s19  ;;  %s1006_s29 = scalar_lea.vmem (!%p176_p3), [#allocation2], %s666_s21 }
  0x21   : > { %872 = dma.done.wait (%p975_p8), %s182_s23, 2048  }
  0x22   : > { %874 = vsyncadd (%p975_p8), %s182_s23, 4294965248  ;;  %v225_v0 = vld [vmem:[%s1006_s29 + $0x70] sm:$0xff]  ;;  %v226_v1 = vld [vmem:[%s1006_s29 + $0x78] sm:$0xff]  ;;  %vm243_vm0 = vcmask 523264   ;;  %s667_s22 = sshll.u32 %s1002_s19, 8  ;;  %s701_s4 = sshll.u32 %s893_s15, 3 }
  0x23   : > { %v223_v2 = vld [vmem:[%s1006_s29 + $0x60] sm:$0xff]  ;;  %300 = vmatpush.msra.mxu0 %v225_v0  ;;  %365 = vmatpush.msra.mxu1 %v226_v1  ;;  %v224_v3 = vld [vmem:[%s1006_s29 + $0x68] sm:$0xff]  ;;  %v221_v4 = vld [vmem:[%s1006_s29 + $0x50] sm:$0xff]  ;;  %s1116_s30 = scalar_lea.vmem [#allocation5], %s667_s22  ;;  %s568_s7 = scalar_lea.hbm %s1222_s3, %s701_s4 }
  0x24   : > { %v222_v5 = vld [vmem:[%s1006_s29 + $0x58] sm:$0xff]  ;;  %705 = vmatpush.msra.mxu2 %v225_v0  ;;  %713 = vmatpush.msra.mxu3 %v226_v1  ;;  %v219_v6 = vld [vmem:[%s1006_s29 + $0x40] sm:$0xff]  ;;  %v220_v7 = vld [vmem:[%s1006_s29 + $0x48] sm:$0xff]  ;;  %s569_s8 = sshll.u32 %s1116_s30, 4  ;;  %s571_s9 = sshll.u32 %s568_s7, 4  ;;  %s570_s8 = int_to_ptr.vmem [resolvable:$true] %s569_s8  ;;  %s572_s9 = int_to_ptr.hbm [resolvable:$true] %s571_s9 }
  0x25   : > { %301 = vmatpush.msra.mxu0 %v223_v2  ;;  %366 = vmatpush.msra.mxu1 %v224_v3  ;;  %v217_v8 = vld [vmem:[%s1006_s29 + $0x30] sm:$0xff]  ;;  %v218_v9 = vld [vmem:[%s1006_s29 + $0x38] sm:$0xff]  ;;  %v215_v10 = vld [vmem:[%s1006_s29 + $0x20] sm:$0xff]  ;;  %s555_s15 = scalar_lea.sflag [#allocation4], %s1002_s19  ;;  %s833_s10 = sshra.s32 %s572_s9, 4  ;;  %s834_s10 = int_to_ptr.hbm [resolvable:$true] %s833_s10 }
  0x26   : > { %706 = vmatpush.msra.mxu2 %v223_v2  ;;  %714 = vmatpush.msra.mxu3 %v224_v3  ;;  %v216_v11 = vld [vmem:[%s1006_s29 + $0x28] sm:$0xff]  ;;  %v213_v12 = vld [vmem:[%s1006_s29 + $0x10] sm:$0xff]  ;;  %v214_v13 = vld [vmem:[%s1006_s29 + $0x18] sm:$0xff]  ;;  %s835_s11 = scalar_lea.hbm %s834_s10, 256  ;;  %s839_s23 = scalar_lea.hbm %s1222_s3, 512 }
  0x27   : > { %302 = vmatpush.msra.mxu0 %v221_v4  ;;  %367 = vmatpush.msra.mxu1 %v222_v5  ;;  %v211_v14 = vld [vmem:[%s1006_s29] sm:$0xff]  ;;  %v212_v15 = vld [vmem:[%s1006_s29 + $0x8] sm:$0xff]  ;;  %v229_v18 = vld [vmem:[%s1220_s1 + $0x10] sm:$0xff]  ;;  %p836_p4 = scmp.ne.s32.totalorder %s834_s10, %s835_s11  ;;  %p840_p7 = scmp.lt.s32.totalorder %s834_s10, %s1222_s3 }
  0x28   : > { %707 = vmatpush.msra.mxu2 %v221_v4  ;;  %715 = vmatpush.msra.mxu3 %v222_v5  ;;  %v227_v16 = vld [vmem:[%s1220_s1] sm:$0xff]  ;;  %v228_v17 = vld [vmem:[%s1220_s1 + $0x8] sm:$0xff]  ;;  %v230_v19 = vld [vmem:[%s1220_s1 + $0x18] sm:$0xff]  ;;  %p841_p8 = scmp.lt.s32.totalorder %s839_s23, %s835_s11 }
  0x29   : > { %303 = vmatpush.msra.mxu0 %v219_v6  ;;  %368 = vmatpush.msra.mxu1 %v220_v7  ;;  %v235_v20 = vld [vmem:[%s1220_s1 + $0x40] sm:$0xff]  ;;  %v236_v22 = vld [vmem:[%s1220_s1 + $0x48] sm:$0xff]  ;;  %v237_v24 = vld [vmem:[%s1220_s1 + $0x50] sm:$0xff]  ;;  %p837_p5 = pnand %p836_p4, %p979_p9 }
  0x2a   : > { %708 = vmatpush.msra.mxu2 %v219_v6  ;;  %716 = vmatpush.msra.mxu3 %v220_v7  ;;  %v231_v21 = vld [vmem:[%s1220_s1 + $0x20] sm:$0xff]  ;;  %v232_v23 = vld [vmem:[%s1220_s1 + $0x28] sm:$0xff]  ;;  %v233_v25 = vld [vmem:[%s1220_s1 + $0x30] sm:$0xff]  ;;  %p842_p10 = por %p841_p8, %p840_p7 }
  0x2b   : > { %304 = vmatpush.msra.mxu0 %v217_v8  ;;  %369 = vmatpush.msra.mxu1 %v218_v9  ;;  %v238_v26 = vld [vmem:[%s1220_s1 + $0x58] sm:$0xff]  ;;  %v239_v28 = vld [vmem:[%s1220_s1 + $0x60] sm:$0xff]  ;;  %v240_v29 = vld [vmem:[%s1220_s1 + $0x68] sm:$0xff]  ;;  %p838_p6 = pneg %p837_p5 }
  0x2c   : > { %709 = vmatpush.msra.mxu2 %v217_v8  ;;  %717 = vmatpush.msra.mxu3 %v218_v9  ;;  %v234_v27 = vld [vmem:[%s1220_s1 + $0x38] sm:$0xff]  ;;  %v241_v30 = vld [vmem:[%s1220_s1 + $0x70] sm:$0xff]  ;;  %v1112_v0 = vld [vmem:[%s1221_s2] ss:$0 sm:$0xff] }
  0x2d   : > { %305 = vmatpush.msra.mxu0 %v215_v10  ;;  %370 = vmatpush.msra.mxu1 %v216_v11  ;;  %v242_v31 = vld [vmem:[%s1220_s1 + $0x78] sm:$0xff]  ;;  %p843_p13 = pnand %p842_p10, %p838_p6 }
  0x2e   : > { %710 = vmatpush.msra.mxu2 %v215_v10  ;;  %718 = vmatpush.msra.mxu3 %v216_v11 }
  0x2f   : > { %306 = vmatpush.msra.mxu0 %v213_v12  ;;  %371 = vmatpush.msra.mxu1 %v214_v13 }
  0x30   : > { %711 = vmatpush.msra.mxu2 %v213_v12  ;;  %719 = vmatpush.msra.mxu3 %v214_v13 }
  0x31   : > { %307 = vmatpush.msra.mxu0 %v211_v14  ;;  %372 = vmatpush.msra.mxu1 %v212_v15 }
  0x32   : > { %668 = vmatmul.msk.f32.vlgmr.msra.gmra.mxu0 %vm243_vm0, %v227_v16  ;;  %684 = vmatmul.msk.f32.vlgmr.msra.gmra.mxu1 %vm243_vm0, %v227_v16 }
  0x33   : > { %712 = vmatpush.msra.mxu2 %v211_v14  ;;  %720 = vmatpush.msra.mxu3 %v212_v15 }
  0x34   : > { %676 = vmatmul.msk.f32.vlgmr.msra.gmra.mxu2 %vm243_vm0, %v235_v20  ;;  %692 = vmatmul.msk.f32.vlgmr.msra.gmra.mxu3 %vm243_vm0, %v235_v20 }
  0x3a   : > { %669 = vmatmul.msk.f32.gmra.mxu0 %vm243_vm0, %v228_v17  ;;  %685 = vmatmul.msk.f32.gmra.mxu1 %vm243_vm0, %v228_v17 }
  0x3c   : > { %677 = vmatmul.msk.f32.gmra.mxu2 %vm243_vm0, %v236_v22  ;;  %693 = vmatmul.msk.f32.gmra.mxu3 %vm243_vm0, %v236_v22 }
  0x42   : > { %670 = vmatmul.msk.f32.gmra.mxu0 %vm243_vm0, %v229_v18  ;;  %686 = vmatmul.msk.f32.gmra.mxu1 %vm243_vm0, %v229_v18 }
  0x44   : > { %678 = vmatmul.msk.f32.gmra.mxu2 %vm243_vm0, %v237_v24  ;;  %694 = vmatmul.msk.f32.gmra.mxu3 %vm243_vm0, %v237_v24 }
  0x4a   : > { %671 = vmatmul.msk.f32.gmra.mxu0 %vm243_vm0, %v230_v19  ;;  %687 = vmatmul.msk.f32.gmra.mxu1 %vm243_vm0, %v230_v19 }
  0x4c   : > { %679 = vmatmul.msk.f32.gmra.mxu2 %vm243_vm0, %v238_v26  ;;  %695 = vmatmul.msk.f32.gmra.mxu3 %vm243_vm0, %v238_v26 }
  0x52   : > { %672 = vmatmul.msk.f32.gmra.mxu0 %vm243_vm0, %v231_v21  ;;  %688 = vmatmul.msk.f32.gmra.mxu1 %vm243_vm0, %v231_v21 }
  0x54   : > { %680 = vmatmul.msk.f32.gmra.mxu2 %vm243_vm0, %v239_v28  ;;  %696 = vmatmul.msk.f32.gmra.mxu3 %vm243_vm0, %v239_v28 }
  0x5a   : > { %673 = vmatmul.msk.f32.gmra.mxu0 %vm243_vm0, %v232_v23  ;;  %689 = vmatmul.msk.f32.gmra.mxu1 %vm243_vm0, %v232_v23 }
  0x5c   : > { %681 = vmatmul.msk.f32.gmra.mxu2 %vm243_vm0, %v240_v29  ;;  %697 = vmatmul.msk.f32.gmra.mxu3 %vm243_vm0, %v240_v29 }
  0x62   : > { %674 = vmatmul.msk.f32.gmra.mxu0 %vm243_vm0, %v233_v25  ;;  %690 = vmatmul.msk.f32.gmra.mxu1 %vm243_vm0, %v233_v25 }
  0x64   : > { %682 = vmatmul.msk.f32.gmra.mxu2 %vm243_vm0, %v241_v30  ;;  %698 = vmatmul.msk.f32.gmra.mxu3 %vm243_vm0, %v241_v30 }
  0x6a   : > { %675 = vmatmul.msk.f32.gmra.mxu0 %vm243_vm0, %v234_v27  ;;  %691 = vmatmul.msk.f32.gmra.mxu1 %vm243_vm0, %v234_v27 }
  0x6c   : > { %683 = vmatmul.msk.f32.gmra.mxu2 %vm243_vm0, %v242_v31  ;;  %699 = vmatmul.msk.f32.gmra.mxu3 %vm243_vm0, %v242_v31 }
  0xaf   : > { %v309_v32 = vpop.f32.mrf.mxu0  ;;  %v374_v33 = vpop.f32.mrf.mxu1 }
  0xb0   : > { %454 = vxpose.xlu1.b32.start [1/16] %v374_v33, 128  ;;  %422 = vxpose.xlu0.b32.start [1/16] %v309_v32, 128 }
  0xb7   : > { %v312_v34 = vpop.f32.mrf.mxu0  ;;  %v377_v35 = vpop.f32.mrf.mxu1 }
  0xb8   : > { %455 = vxpose.xlu1.b32.cont [2/16] %v377_v35, 128  ;;  %423 = vxpose.xlu0.b32.cont [2/16] %v312_v34, 128  ;;  %v333_v44 = vpop.f32.mrf.mxu2  ;;  %v398_v45 = vpop.f32.mrf.mxu3 }
  0xbf   : > { %v315_v36 = vpop.f32.mrf.mxu0  ;;  %v380_v37 = vpop.f32.mrf.mxu1 }
  0xc0   : > { %456 = vxpose.xlu1.b32.cont [3/16] %v380_v37, 128  ;;  %424 = vxpose.xlu0.b32.cont [3/16] %v315_v36, 128  ;;  %v336_v50 = vpop.f32.mrf.mxu2  ;;  %v401_v51 = vpop.f32.mrf.mxu3 }
  0xc7   : > { %v318_v38 = vpop.f32.mrf.mxu0  ;;  %v383_v39 = vpop.f32.mrf.mxu1 }
  0xc8   : > { %457 = vxpose.xlu1.b32.cont [4/16] %v383_v39, 128  ;;  %425 = vxpose.xlu0.b32.cont [4/16] %v318_v38, 128  ;;  %v339_v52 = vpop.f32.mrf.mxu2  ;;  %v404_v53 = vpop.f32.mrf.mxu3 }
  0xcf   : > { %v321_v40 = vpop.f32.mrf.mxu0  ;;  %v386_v41 = vpop.f32.mrf.mxu1 }
  0xd0   : > { %458 = vxpose.xlu1.b32.cont [5/16] %v386_v41, 128  ;;  %426 = vxpose.xlu0.b32.cont [5/16] %v321_v40, 128  ;;  %v342_v54 = vpop.f32.mrf.mxu2  ;;  %v407_v55 = vpop.f32.mrf.mxu3 }
  0xd7   : > { %v324_v42 = vpop.f32.mrf.mxu0  ;;  %v389_v43 = vpop.f32.mrf.mxu1 }
  0xd8   : > { %459 = vxpose.xlu1.b32.cont [6/16] %v389_v43, 128  ;;  %427 = vxpose.xlu0.b32.cont [6/16] %v324_v42, 128  ;;  %v345_v56 = vpop.f32.mrf.mxu2  ;;  %v410_v57 = vpop.f32.mrf.mxu3 }
  0xdf   : > { %v327_v46 = vpop.f32.mrf.mxu0  ;;  %v392_v47 = vpop.f32.mrf.mxu1 }
  0xe0   : > { %460 = vxpose.xlu1.b32.cont [7/16] %v392_v47, 128  ;;  %428 = vxpose.xlu0.b32.cont [7/16] %v327_v46, 128  ;;  %v348_v58 = vpop.f32.mrf.mxu2  ;;  %v413_v59 = vpop.f32.mrf.mxu3 }
  0xe7   : > { %v330_v48 = vpop.f32.mrf.mxu0  ;;  %v395_v49 = vpop.f32.mrf.mxu1 }
  0xe8   : > { %461 = vxpose.xlu1.b32.cont [8/16] %v395_v49, 128  ;;  %429 = vxpose.xlu0.b32.cont [8/16] %v330_v48, 128  ;;  %v351_v60 = vpop.f32.mrf.mxu2  ;;  %v416_v61 = vpop.f32.mrf.mxu3 }
  0xf0   : > { %462 = vxpose.xlu1.b32.cont [9/16] %v398_v45, 128  ;;  %430 = vxpose.xlu0.b32.cont [9/16] %v333_v44, 128  ;;  %v354_v62 = vpop.f32.mrf.mxu2  ;;  %v419_v63 = vpop.f32.mrf.mxu3 }
  0xf8   : > { %463 = vxpose.xlu1.b32.cont [10/16] %v401_v51, 128  ;;  %431 = vxpose.xlu0.b32.cont [10/16] %v336_v50, 128 }
 0x100   : > { %464 = vxpose.xlu1.b32.cont [11/16] %v404_v53, 128  ;;  %432 = vxpose.xlu0.b32.cont [11/16] %v339_v52, 128 }
 0x108   : > { %465 = vxpose.xlu1.b32.cont [12/16] %v407_v55, 128  ;;  %433 = vxpose.xlu0.b32.cont [12/16] %v342_v54, 128 }
 0x110   : > { %466 = vxpose.xlu1.b32.cont [13/16] %v410_v57, 128  ;;  %434 = vxpose.xlu0.b32.cont [13/16] %v345_v56, 128 }
 0x118   : > { %467 = vxpose.xlu1.b32.cont [14/16] %v413_v59, 128  ;;  %435 = vxpose.xlu0.b32.cont [14/16] %v348_v58, 128 }
 0x120   : > { %468 = vxpose.xlu1.b32.cont [15/16] %v416_v61, 128  ;;  %436 = vxpose.xlu0.b32.cont [15/16] %v351_v60, 128 }
 0x128   : > { %469 = vxpose.xlu1.b32.end [16/16] %v419_v63, 128  ;;  %437 = vxpose.xlu0.b32.end [16/16] %v354_v62, 128 }
 0x154   : > { %v470_v1 = vpop.trf.xlu1  ;;  %v438_v2 = vpop.trf.xlu0 }
 0x155   : > { %v506_v3 = vadd.f32 %v1112_v0, %v470_v1  ;;  %v490_v4 = vadd.f32 %v1112_v0, %v438_v2 }
 0x157   : > { %538 = vst [vmem:[%s1116_s30 + $0x80] sm:$0xff] %v506_v3 }
 0x158   : > { %522 = vst [vmem:[%s1116_s30] sm:$0xff] %v490_v4 }
 0x15c   : > { %v471_v5 = vpop.trf.xlu1  ;;  %v439_v6 = vpop.trf.xlu0 }
 0x15d   : > { %v507_v7 = vadd.f32 %v1112_v0, %v471_v5  ;;  %v491_v8 = vadd.f32 %v1112_v0, %v439_v6 }
 0x15f   : > { %539 = vst [vmem:[%s1116_s30 + $0x88] sm:$0xff] %v507_v7 }
 0x160   : > { %523 = vst [vmem:[%s1116_s30 + $0x8] sm:$0xff] %v491_v8 }
 0x164   : > { %v472_v9 = vpop.trf.xlu1  ;;  %v440_v10 = vpop.trf.xlu0 }
 0x165   : > { %v508_v11 = vadd.f32 %v1112_v0, %v472_v9  ;;  %v492_v12 = vadd.f32 %v1112_v0, %v440_v10 }
 0x167   : > { %540 = vst [vmem:[%s1116_s30 + $0x90] sm:$0xff] %v508_v11 }
 0x168   : > { %524 = vst [vmem:[%s1116_s30 + $0x10] sm:$0xff] %v492_v12 }
 0x16c   : > { %v473_v13 = vpop.trf.xlu1  ;;  %v441_v14 = vpop.trf.xlu0 }
 0x16d   : > { %v509_v15 = vadd.f32 %v1112_v0, %v473_v13  ;;  %v493_v16 = vadd.f32 %v1112_v0, %v441_v14 }
 0x16f   : > { %541 = vst [vmem:[%s1116_s30 + $0x98] sm:$0xff] %v509_v15 }
 0x170   : > { %525 = vst [vmem:[%s1116_s30 + $0x18] sm:$0xff] %v493_v16 }
 0x174   : > { %v474_v17 = vpop.trf.xlu1  ;;  %v442_v18 = vpop.trf.xlu0 }
 0x175   : > { %v510_v19 = vadd.f32 %v1112_v0, %v474_v17  ;;  %v494_v20 = vadd.f32 %v1112_v0, %v442_v18 }
 0x177   : > { %542 = vst [vmem:[%s1116_s30 + $0xa0] sm:$0xff] %v510_v19 }
 0x178   : > { %526 = vst [vmem:[%s1116_s30 + $0x20] sm:$0xff] %v494_v20 }
 0x17c   : > { %v475_v21 = vpop.trf.xlu1  ;;  %v443_v22 = vpop.trf.xlu0 }
 0x17d   : > { %v511_v23 = vadd.f32 %v1112_v0, %v475_v21  ;;  %v495_v24 = vadd.f32 %v1112_v0, %v443_v22 }
 0x17f   : > { %543 = vst [vmem:[%s1116_s30 + $0xa8] sm:$0xff] %v511_v23 }
 0x180   : > { %527 = vst [vmem:[%s1116_s30 + $0x28] sm:$0xff] %v495_v24 }
 0x184   : > { %v476_v25 = vpop.trf.xlu1  ;;  %v444_v26 = vpop.trf.xlu0 }
 0x185   : > { %v512_v27 = vadd.f32 %v1112_v0, %v476_v25  ;;  %v496_v28 = vadd.f32 %v1112_v0, %v444_v26 }
 0x187   : > { %544 = vst [vmem:[%s1116_s30 + $0xb0] sm:$0xff] %v512_v27 }
 0x188   : > { %528 = vst [vmem:[%s1116_s30 + $0x30] sm:$0xff] %v496_v28 }
 0x18c   : > { %v477_v29 = vpop.trf.xlu1  ;;  %v445_v30 = vpop.trf.xlu0 }
 0x18d   : > { %v513_v31 = vadd.f32 %v1112_v0, %v477_v29  ;;  %v497_v32 = vadd.f32 %v1112_v0, %v445_v30 }
 0x18f   : > { %545 = vst [vmem:[%s1116_s30 + $0xb8] sm:$0xff] %v513_v31 }
 0x190   : > { %529 = vst [vmem:[%s1116_s30 + $0x38] sm:$0xff] %v497_v32 }
 0x194   : > { %v478_v33 = vpop.trf.xlu1  ;;  %v446_v34 = vpop.trf.xlu0 }
 0x195   : > { %v514_v35 = vadd.f32 %v1112_v0, %v478_v33  ;;  %v498_v36 = vadd.f32 %v1112_v0, %v446_v34 }
 0x197   : > { %546 = vst [vmem:[%s1116_s30 + $0xc0] sm:$0xff] %v514_v35 }
 0x198   : > { %530 = vst [vmem:[%s1116_s30 + $0x40] sm:$0xff] %v498_v36 }
 0x19c   : > { %v479_v37 = vpop.trf.xlu1  ;;  %v447_v38 = vpop.trf.xlu0 }
 0x19d   : > { %v515_v39 = vadd.f32 %v1112_v0, %v479_v37  ;;  %v499_v40 = vadd.f32 %v1112_v0, %v447_v38 }
 0x19f   : > { %547 = vst [vmem:[%s1116_s30 + $0xc8] sm:$0xff] %v515_v39 }
 0x1a0   : > { %531 = vst [vmem:[%s1116_s30 + $0x48] sm:$0xff] %v499_v40 }
 0x1a4   : > { %v480_v41 = vpop.trf.xlu1  ;;  %v448_v42 = vpop.trf.xlu0 }
 0x1a5   : > { %v516_v43 = vadd.f32 %v1112_v0, %v480_v41  ;;  %v500_v44 = vadd.f32 %v1112_v0, %v448_v42 }
 0x1a7   : > { %548 = vst [vmem:[%s1116_s30 + $0xd0] sm:$0xff] %v516_v43 }
 0x1a8   : > { %532 = vst [vmem:[%s1116_s30 + $0x50] sm:$0xff] %v500_v44 }
 0x1ac   : > { %v481_v45 = vpop.trf.xlu1  ;;  %v449_v46 = vpop.trf.xlu0 }
 0x1ad   : > { %v517_v47 = vadd.f32 %v1112_v0, %v481_v45  ;;  %v501_v48 = vadd.f32 %v1112_v0, %v449_v46 }
 0x1af   : > { %549 = vst [vmem:[%s1116_s30 + $0xd8] sm:$0xff] %v517_v47 }
 0x1b0   : > { %533 = vst [vmem:[%s1116_s30 + $0x58] sm:$0xff] %v501_v48 }
 0x1b4   : > { %v482_v49 = vpop.trf.xlu1  ;;  %v450_v50 = vpop.trf.xlu0 }
 0x1b5   : > { %v518_v51 = vadd.f32 %v1112_v0, %v482_v49  ;;  %v502_v52 = vadd.f32 %v1112_v0, %v450_v50 }
 0x1b7   : > { %550 = vst [vmem:[%s1116_s30 + $0xe0] sm:$0xff] %v518_v51 }
 0x1b8   : > { %534 = vst [vmem:[%s1116_s30 + $0x60] sm:$0xff] %v502_v52 }
 0x1bc   : > { %v483_v53 = vpop.trf.xlu1  ;;  %v451_v54 = vpop.trf.xlu0 }
 0x1bd   : > { %v519_v55 = vadd.f32 %v1112_v0, %v483_v53  ;;  %v503_v56 = vadd.f32 %v1112_v0, %v451_v54 }
 0x1bf   : > { %551 = vst [vmem:[%s1116_s30 + $0xe8] sm:$0xff] %v519_v55 }
 0x1c0   : > { %535 = vst [vmem:[%s1116_s30 + $0x68] sm:$0xff] %v503_v56 }
 0x1c4   : > { %v484_v57 = vpop.trf.xlu1  ;;  %v452_v58 = vpop.trf.xlu0 }
 0x1c5   : > { %v520_v59 = vadd.f32 %v1112_v0, %v484_v57  ;;  %v504_v60 = vadd.f32 %v1112_v0, %v452_v58 }
 0x1c7   : > { %552 = vst [vmem:[%s1116_s30 + $0xf0] sm:$0xff] %v520_v59 }
 0x1c8   : > { %536 = vst [vmem:[%s1116_s30 + $0x70] sm:$0xff] %v504_v60 }
 0x1cc   : > { %v485_v61 = vpop.trf.xlu1  ;;  %v453_v62 = vpop.trf.xlu0 }
 0x1cd   : > { %v521_v63 = vadd.f32 %v1112_v0, %v485_v61  ;;  %v505_v1 = vadd.f32 %v1112_v0, %v453_v62 }
 0x1cf   : > { %553 = vst [vmem:[%s1116_s30 + $0xf8] sm:$0xff] %v521_v63 }
 0x1d0   : > { %537 = vst [vmem:[%s1116_s30 + $0x78] sm:$0xff] %v505_v1 }
 0x1d1   : > { %846 = shalt.err (!%p843_p13)
}
 0x1d2   : > { %s905_s19 = smov 128   ;;  %s906_s24 = smov 256  }
 0x1d3   : > { %s907_s28 = smov 8  }
 0x1d4   : > { %723 = dma.vmem_to_hbm [thread:$0]  (%p979_p9), %s570_s8, 4096, %s572_s9, %s555_s15, %s905_s19, %s906_s24, %s907_s28  }
 0x1d5 PF: > { %s586_s30 = sand.u32 1, %s881_s12   ;;  %p730_p0 = pnand %p661_p12, %p986_p11 }
 0x1d6   : > { %s587_s4 = scalar_lea.sflag [#allocation4], %s586_s30 }
 0x1d7   : > { %p731_p1 = pneg %p730_p0 }
 0x1d9   : > { %876 = dma.done.wait (%p731_p1), %s587_s4, 4096  }
 0x1da   : > { %878 = vsyncadd (%p731_p1), %s587_s4, 4294963200  ;;  %s19_s17 = sadd.s32 1, %s901_s17   ;;  %s1227_s12 = smov %s885_s13 }
 0x1db   : > { %p16_p2 = scmp.ge.s32.totalorder %s19_s17, 4   ;;  %s1228_s13 = smov %s889_s14 }
 0x1dc   : > { %s1229_s14 = smov %s984_s26  ;;  %s1230_s15 = smov %s897_s16 }
 0x1dd   : > { %s1231_s16 = smov %s1233_s20  ;;  %18 = sbr.rel (!%p16_p2) target bundleno = 6 (0x6), region = 77 }
 0x1e2   :  { %593 = vsyncpa [#allocation3], 1 }
 0x1e3   :  { %595 = vsyncpa [#allocation3 + $0x1], 1 }
 0x1e4   :  { %596 = vsyncpa [#allocation4], 1 }
 0x1e5   :  { %598 = vsyncpa [#allocation4 + $0x1], 1 }

</bundles_post_ra>
